<compile_context>
chip_gen: v5e
topology: v5e:2x2
jax: 0.10.0
libtpu: 0.0.40
codegen_flags: <defaults>
</compile_context>

<pallas_src>
import functools

import jax
import jax.numpy as jnp
from jax.experimental import pallas as pl
from jax.experimental.pallas import tpu as pltpu


def _round_up(n: int, m: int) -> int:
    return ((n + m - 1) // m) * m


def _distance_kernel(inp_ref, w1_ref, b1_ref, w2_ref, b2_ref, w3_ref, b3_ref,
                     out_ref):
    """Pure MXU + bias/ReLU:  relu(x@W1+b1) -> relu(@W2+b2) -> @W3+b3."""
    h = jnp.dot(inp_ref[...], w1_ref[...],
                preferred_element_type=jnp.float32) + b1_ref[...]
    h = jnp.maximum(h, 0.0)
    h = jnp.dot(h, w2_ref[...],
                preferred_element_type=jnp.float32) + b2_ref[...]
    h = jnp.maximum(h, 0.0)
    out_ref[...] = jnp.dot(h, w3_ref[...],
                           preferred_element_type=jnp.float32) + b3_ref[...]


def fold_parameters(raw):
    """Fold z-scoring into (W1, b1) and dist_mean into (W3, b3).

    raw keys: theta_mean/theta_std [1,Dt], x_mean/x_std [1,Dx],
              w1_theta [Dt,H], w1_x [Dx,H], b1 [1,H],
              w2 [H,H], b2 [1,H], w3 [H,1], b3 [1,1], dist_mean [1,1].
    """
    # clamp std BEFORE folding 1/std into the weights (avoid inf weights)
    t_std = jnp.maximum(raw["theta_std"], 1e-14)
    x_std = jnp.maximum(raw["x_std"], 1e-14)
    std = jnp.concatenate([t_std, x_std], axis=-1)                  # [1, D]
    mean = jnp.concatenate([raw["theta_mean"], raw["x_mean"]], axis=-1)

    w1_raw = jnp.concatenate([raw["w1_theta"], raw["w1_x"]], axis=0)  # [D, H]
    w1 = w1_raw / std.reshape(-1, 1)                                  # W1 / s^T
    b1 = raw["b1"] - mean @ w1                                        # b1 - (m/s)@W1

    dm = raw["dist_mean"].reshape(())
    w3 = raw["w3"] * dm
    b3 = raw["b3"] * dm

    return {
        "w1": w1.astype(jnp.float32), "b1": b1.astype(jnp.float32),
        "w2": raw["w2"].astype(jnp.float32), "b2": raw["b2"].astype(jnp.float32),
        "w3": w3.astype(jnp.float32), "b3": b3.astype(jnp.float32),
    }


@functools.partial(jax.jit, static_argnames=("tile_b",))
def distance_estimator_forward(theta, x, folded, tile_b: int = 1024):
    """theta: [B, Dt] f32, x: [B, Dx] f32 -> [B, 1] f32.

    `folded` is the output of fold_parameters().
    tile_b sized for the 32 MiB default scoped-VMEM limit (fits v5e/v6e/v7x):
    at tile_b=1024 the double-buffered input + output tiles use ~2 MiB.
    """
    inp = jnp.concatenate([theta, x], axis=-1).astype(jnp.float32)   # [B, D]
    B, D = inp.shape
    H = folded["w1"].shape[1]

    # Batch tiling: pad B up to a multiple of the tile (tail rows are zeros,
    # sliced off below). Tile must satisfy the (8,128)/full-dim constraint.
    tile_b = min(tile_b, _round_up(B, 8))
    b_pad = _round_up(B, tile_b)
    if b_pad != B:
        inp = jnp.pad(inp, ((0, b_pad - B), (0, 0)))
    grid = (b_pad // tile_b,)

    weight_bytes = 4 * (D * H + H + H * H + H + H + 1)
    cost = pl.CostEstimate(
        flops=2 * b_pad * (D * H + H * H + H),
        transcendentals=0,
        bytes_accessed=4 * b_pad * (D + 1) + weight_bytes,
    )

    out = pl.pallas_call(
        _distance_kernel,
        out_shape=jax.ShapeDtypeStruct((b_pad, 1), jnp.float32),
        grid=grid,
        in_specs=[
            pl.BlockSpec((tile_b, D), lambda i: (i, 0)),   # batch-tiled input
            pl.BlockSpec((D, H), lambda i: (0, 0)),        # weights stay resident
            pl.BlockSpec((1, H), lambda i: (0, 0)),
            pl.BlockSpec((H, H), lambda i: (0, 0)),
            pl.BlockSpec((1, H), lambda i: (0, 0)),
            pl.BlockSpec((H, 1), lambda i: (0, 0)),
            pl.BlockSpec((1, 1), lambda i: (0, 0)),
        ],
        out_specs=pl.BlockSpec((tile_b, 1), lambda i: (i, 0)),
        compiler_params=pltpu.CompilerParams(
            dimension_semantics=("parallel",),   # shards across 2 TCs on v7x
            vmem_limit_bytes=64 << 20,
        ),
        cost_estimate=cost,
    )(inp, folded["w1"], folded["b1"], folded["w2"], folded["b2"],
      folded["w3"], folded["b3"])

    return out[:B]


def _reference_forward(theta, x, raw):
    """Pure-JAX reference mirroring the PyTorch module (unfolded params)."""
    t_std = jnp.maximum(raw["theta_std"], 1e-14)
    x_std = jnp.maximum(raw["x_std"], 1e-14)
    theta_z = (theta - raw["theta_mean"]) / t_std
    x_z = (x - raw["x_mean"]) / x_std
    h = jnp.concatenate([theta_z, x_z], axis=-1)
    w1 = jnp.concatenate([raw["w1_theta"], raw["w1_x"]], axis=0)
    h = jnp.maximum(h @ w1 + raw["b1"], 0.0)
    h = jnp.maximum(h @ raw["w2"] + raw["b2"], 0.0)
    out = h @ raw["w3"] + raw["b3"]
    return out * raw["dist_mean"][0, 0]


if __name__ == "__main__":
    # Shapes consistent with the module: theta [B, theta_dim], x [B, x_dim],
    # hidden_features=H, num_layers=2, output_dim=1.
    B, Dt, Dx, H = 8, 4, 12, 32

    key = jax.random.PRNGKey(0)
    keys = jax.random.split(key, 14)

    # "Training" data used by __init__ to build standardizing nets / dist mean.
    theta_train = jax.random.normal(keys[0], (64, Dt), jnp.float32) * 2.0 + 0.5
    x_train = jax.random.normal(keys[1], (64, Dx), jnp.float32) * 3.0 - 1.0
    dists = jnp.abs(jax.random.normal(keys[2], (64,), jnp.float32)) + 0.1

    scale1 = 1.0 / jnp.sqrt(jnp.float32(Dt + Dx))
    scale2 = 1.0 / jnp.sqrt(jnp.float32(H))
    raw_params = {
        "theta_mean": jnp.mean(theta_train, axis=0, keepdims=True),
        "theta_std": jnp.std(theta_train, axis=0, ddof=1, keepdims=True),
        "x_mean": jnp.mean(x_train, axis=0, keepdims=True),
        "x_std": jnp.std(x_train, axis=0, ddof=1, keepdims=True),
        "w1_theta": jax.random.normal(keys[3], (Dt, H), jnp.float32) * scale1,
        "w1_x": jax.random.normal(keys[4], (Dx, H), jnp.float32) * scale1,
        "b1": jax.random.normal(keys[5], (1, H), jnp.float32) * 0.01,
        "w2": jax.random.normal(keys[6], (H, H), jnp.float32) * scale2,
        "b2": jax.random.normal(keys[7], (1, H), jnp.float32) * 0.01,
        "w3": jax.random.normal(keys[8], (H, 1), jnp.float32) * scale2,
        "b3": jax.random.normal(keys[9], (1, 1), jnp.float32) * 0.01,
        "dist_mean": jnp.mean(dists).reshape(1, 1),
    }
    folded = fold_parameters(raw_params)

    # Primary small-batch check.
    theta = jax.random.normal(keys[10], (B, Dt), jnp.float32)
    x = jax.random.normal(keys[11], (B, Dx), jnp.float32)
    out = jax.block_until_ready(distance_estimator_forward(theta, x, folded))
    ref = _reference_forward(theta, x, raw_params)
    assert out.shape == (B, 1)
    assert jnp.allclose(out, ref, atol=1e-4, rtol=1e-4), (out, ref)

    # Secondary check exercising the batch grid + tail padding (B % tile != 0).
    B2 = 300
    theta2 = jax.random.normal(keys[12], (B2, Dt), jnp.float32)
    x2 = jax.random.normal(keys[13], (B2, Dx), jnp.float32)
    out2 = jax.block_until_ready(
        distance_estimator_forward(theta2, x2, folded, tile_b=128))
    ref2 = _reference_forward(theta2, x2, raw_params)
    assert out2.shape == (B2, 1)
    assert jnp.allclose(out2, ref2, atol=1e-4, rtol=1e-4)

    print("KERNEL_OK")
</pallas_src>

<mosaic_0001>
module attributes {stable_mosaic.version = 11 : i64} {
  func.func @_distance_kernel(%arg0: i32, %arg1: memref<8x16xf32, #tpu.memory_space<vmem>>, %arg2: memref<16x32xf32, #tpu.memory_space<vmem>>, %arg3: memref<1x32xf32, #tpu.memory_space<vmem>>, %arg4: memref<32x32xf32, #tpu.memory_space<vmem>>, %arg5: memref<1x32xf32, #tpu.memory_space<vmem>>, %arg6: memref<32x1xf32, #tpu.memory_space<vmem>>, %arg7: memref<1x1xf32, #tpu.memory_space<vmem>>, %arg8: memref<8x1xf32, #tpu.memory_space<vmem>>) attributes {dimension_semantics = [#tpu.dimension_semantics<parallel>], iteration_bounds = array<i64: 1>, scalar_prefetch = 0 : i64, scratch_operands = 0 : i64, tpu.core_type = #tpu.core_type<tc>, window_params = [{transform_indices = @transform_0, window_bounds = array<i64: 8, 16>}, {pipeline_mode = #tpu.pipeline_mode<synchronous>, transform_indices = @transform_1, window_bounds = array<i64: 16, 32>}, {pipeline_mode = #tpu.pipeline_mode<synchronous>, transform_indices = @transform_2, window_bounds = array<i64: 1, 32>}, {pipeline_mode = #tpu.pipeline_mode<synchronous>, transform_indices = @transform_3, window_bounds = array<i64: 32, 32>}, {pipeline_mode = #tpu.pipeline_mode<synchronous>, transform_indices = @transform_4, window_bounds = array<i64: 1, 32>}, {pipeline_mode = #tpu.pipeline_mode<synchronous>, transform_indices = @transform_5, window_bounds = array<i64: 32, 1>}, {pipeline_mode = #tpu.pipeline_mode<synchronous>, transform_indices = @transform_6, window_bounds = array<i64: 1, 1>}, {transform_indices = @transform_7, window_bounds = array<i64: 8, 1>}]} {
    %c0 = arith.constant 0 : index
    %c0_0 = arith.constant 0 : index
    %0 = vector.load %arg1[%c0, %c0_0] : memref<8x16xf32, #tpu.memory_space<vmem>>, vector<8x16xf32>
    %c0_1 = arith.constant 0 : index
    %c0_2 = arith.constant 0 : index
    %1 = vector.load %arg2[%c0_1, %c0_2] : memref<16x32xf32, #tpu.memory_space<vmem>>, vector<16x32xf32>
    %cst = arith.constant dense<0.000000e+00> : vector<8x32xf32>
    %2 = tpu.matmul %0, %1, %cst {dimension_numbers = #tpu.dot_dimension_numbers<[1], [0], [0], [1], [0, 0, 1, 1], [], []>} : vector<8x16xf32>, vector<16x32xf32>, vector<8x32xf32> -> vector<8x32xf32>
    %c0_3 = arith.constant 0 : index
    %c0_4 = arith.constant 0 : index
    %3 = vector.load %arg3[%c0_3, %c0_4] : memref<1x32xf32, #tpu.memory_space<vmem>>, vector<1x32xf32>
    %4 = vector.broadcast %3 : vector<1x32xf32> to vector<8x32xf32>
    %5 = arith.addf %2, %4 : vector<8x32xf32>
    %cst_5 = arith.constant 0.000000e+00 : f32
    %6 = vector.broadcast %cst_5 : f32 to vector<8x32xf32>
    %7 = arith.maximumf %5, %6 : vector<8x32xf32>
    %c0_6 = arith.constant 0 : index
    %c0_7 = arith.constant 0 : index
    %8 = vector.load %arg4[%c0_6, %c0_7] : memref<32x32xf32, #tpu.memory_space<vmem>>, vector<32x32xf32>
    %cst_8 = arith.constant dense<0.000000e+00> : vector<8x32xf32>
    %9 = tpu.matmul %7, %8, %cst_8 {dimension_numbers = #tpu.dot_dimension_numbers<[1], [0], [0], [1], [0, 0, 1, 1], [], []>} : vector<8x32xf32>, vector<32x32xf32>, vector<8x32xf32> -> vector<8x32xf32>
    %c0_9 = arith.constant 0 : index
    %c0_10 = arith.constant 0 : index
    %10 = vector.load %arg5[%c0_9, %c0_10] : memref<1x32xf32, #tpu.memory_space<vmem>>, vector<1x32xf32>
    %11 = vector.broadcast %10 : vector<1x32xf32> to vector<8x32xf32>
    %12 = arith.addf %9, %11 : vector<8x32xf32>
    %cst_11 = arith.constant 0.000000e+00 : f32
    %13 = vector.broadcast %cst_11 : f32 to vector<8x32xf32>
    %14 = arith.maximumf %12, %13 : vector<8x32xf32>
    %c0_12 = arith.constant 0 : index
    %c0_13 = arith.constant 0 : index
    %15 = vector.load %arg6[%c0_12, %c0_13] : memref<32x1xf32, #tpu.memory_space<vmem>>, vector<32x1xf32>
    %cst_14 = arith.constant dense<0.000000e+00> : vector<8x1xf32>
    %16 = tpu.matmul %14, %15, %cst_14 {dimension_numbers = #tpu.dot_dimension_numbers<[1], [0], [0], [1], [0, 0, 1, 1], [], []>} : vector<8x32xf32>, vector<32x1xf32>, vector<8x1xf32> -> vector<8x1xf32>
    %c0_15 = arith.constant 0 : index
    %c0_16 = arith.constant 0 : index
    %17 = vector.load %arg7[%c0_15, %c0_16] : memref<1x1xf32, #tpu.memory_space<vmem>>, vector<1x1xf32>
    %18 = vector.broadcast %17 : vector<1x1xf32> to vector<8x1xf32>
    %19 = arith.addf %16, %18 : vector<8x1xf32>
    %c0_17 = arith.constant 0 : index
    %c0_18 = arith.constant 0 : index
    %20 = vector.load %arg8[%c0_17, %c0_18] : memref<8x1xf32, #tpu.memory_space<vmem>>, vector<8x1xf32>
    tpu.vector_store %arg8[%c0_17, %c0_18], %19 {strides = array<i32>} : memref<8x1xf32, #tpu.memory_space<vmem>>, vector<8x1xf32>,
    return
  }
  func.func @transform_0(%arg0: i32) -> (i32, i32) {
    %c0_i32 = arith.constant 0 : i32
    %c0_i32_0 = arith.constant 0 : i32
    return %arg0, %c0_i32 : i32, i32
  }
  func.func @transform_1(%arg0: i32) -> (i32, i32) {
    %c0_i32 = arith.constant 0 : i32
    %c0_i32_0 = arith.constant 0 : i32
    %c0_i32_1 = arith.constant 0 : i32
    return %c0_i32, %c0_i32_0 : i32, i32
  }
  func.func @transform_2(%arg0: i32) -> (i32, i32) {
    %c0_i32 = arith.constant 0 : i32
    %c0_i32_0 = arith.constant 0 : i32
    %c0_i32_1 = arith.constant 0 : i32
    return %c0_i32, %c0_i32_0 : i32, i32
  }
  func.func @transform_3(%arg0: i32) -> (i32, i32) {
    %c0_i32 = arith.constant 0 : i32
    %c0_i32_0 = arith.constant 0 : i32
    %c0_i32_1 = arith.constant 0 : i32
    return %c0_i32, %c0_i32_0 : i32, i32
  }
  func.func @transform_4(%arg0: i32) -> (i32, i32) {
    %c0_i32 = arith.constant 0 : i32
    %c0_i32_0 = arith.constant 0 : i32
    %c0_i32_1 = arith.constant 0 : i32
    return %c0_i32, %c0_i32_0 : i32, i32
  }
  func.func @transform_5(%arg0: i32) -> (i32, i32) {
    %c0_i32 = arith.constant 0 : i32
    %c0_i32_0 = arith.constant 0 : i32
    %c0_i32_1 = arith.constant 0 : i32
    return %c0_i32, %c0_i32_0 : i32, i32
  }
  func.func @transform_6(%arg0: i32) -> (i32, i32) {
    %c0_i32 = arith.constant 0 : i32
    %c0_i32_0 = arith.constant 0 : i32
    %c0_i32_1 = arith.constant 0 : i32
    return %c0_i32, %c0_i32_0 : i32, i32
  }
  func.func @transform_7(%arg0: i32) -> (i32, i32) {
    %c0_i32 = arith.constant 0 : i32
    %c0_i32_0 = arith.constant 0 : i32
    return %arg0, %c0_i32 : i32, i32
  }
}

</mosaic_0001>

<bundles_post_ra>
// kernel: distance_estimator_forward.1
= control target key start
LH: loop header
LB: loop body
LE: loop exit
PB: predicated region body
PF: predicated region fallthrough
CT: control target
= control target key end

     0   :  { %vm35_vm0 = vcmask 130048   ;;  %vm68_vm1 = vcmask 261120   ;;  %vm124_vm2 = vcmask 7168   ;;  %s223_s1 = inlined_call_operand.vmem [shape: f32[16,32], index: 1, kind: input, shape index: {}]   ;;  %s224_s0 = inlined_call_operand.vmem [shape: f32[8,16], index: 0, kind: input, shape index: {}]   ;;  %s225_s3 = inlined_call_operand.vmem [shape: f32[32,32], index: 3, kind: input, shape index: {}]   ;;  %s226_s2 = inlined_call_operand.vmem [shape: f32[1,32], index: 2, kind: input, shape index: {}]   ;;  %s227_s4 = inlined_call_operand.vmem [shape: f32[1,32], index: 4, kind: input, shape index: {}]   ;;  %s228_s5 = inlined_call_operand.vmem [shape: f32[32,1], index: 5, kind: input, shape index: {}]   ;;  %s229_s6 = inlined_call_operand.<no memory space> [shape: f32[1,1], index: 6, kind: input, shape index: {}]   ;;  %s230_s7 = inlined_call_operand.vmem [shape: f32[8,1], index: 7, kind: output, shape index: {}]  }
   0x1   :  { %v30_v0 = vld [vmem:[%s223_s1 + $0x8] sm:$0xff]  ;;  %v29_v1 = vld [vmem:[%s223_s1] sm:$0xff]  ;;  %v63_v3 = vld [vmem:[%s225_s3 + $0x18] sm:$0xff]  ;;  %v12_v15 = vstv %s229_s6 }
   0x2   :  { %53 = vmatpush.msra.mxu0 %v30_v0  ;;  %v28_v2 = vld [vmem:[%s224_s0] sm:$0xff]  ;;  %84 = vmatpush.msra.mxu1 %v63_v3  ;;  %v62_v4 = vld [vmem:[%s225_s3 + $0x10] sm:$0xff]  ;;  %v61_v5 = vld [vmem:[%s225_s3 + $0x8] sm:$0xff]  ;;  %13 = vst [vmem:[#allocation2] sm:$0x1] %v12_v15 }
   0x3   :  { %v60_v6 = vld [vmem:[%s225_s3] sm:$0xff]  ;;  %v96_v7 = vld [vmem:[%s228_s5 + $0x18] sm:$0xff]  ;;  %v95_v12 = vld [vmem:[%s228_s5 + $0x10] sm:$0xff] }
   0x4   :  { %54 = vmatpush.msra.mxu0 %v29_v1  ;;  %85 = vmatpush.msra.mxu1 %v62_v4  ;;  %v133_v8 = vld [vmem:[%s226_s2] ss:$0 sm:$0xff]  ;;  %v94_v13 = vld [vmem:[%s228_s5 + $0x8] sm:$0xff] }
   0x5   :  { %130 = vmatmul.msk.f32.vlgmr.msra.gmra.mxu0 %vm35_vm0, %v28_v2  ;;  %116 = vmatpush.msra.mxu2 %v96_v7  ;;  %v93_v14 = vld [vmem:[%s228_s5] sm:$0xff] }
   0x6   :  { %86 = vmatpush.msra.mxu1 %v61_v5  ;;  %v134_v16 = vld [vmem:[%s227_s4] ss:$0 sm:$0xff] }
   0x7   :  { %117 = vmatpush.msra.mxu2 %v95_v12 }
   0x8   :  { %87 = vmatpush.msra.mxu1 %v60_v6 }
   0x9   :  { %118 = vmatpush.msra.mxu2 %v94_v13  ;;  %v135_v20 = vld [vmem:[#allocation2] ss:$0 sm:$0xff] }
   0xb   :  { %119 = vmatpush.msra.mxu2 %v93_v14 }
  0x82   :  { %v56_v9 = vpop.f32.mrf.mxu0 }
  0x83   :  { %v57_v10 = vadd.f32 %v133_v8, %v56_v9 }
  0x85   :  { %v59_v11 = vmax.f32 %v57_v10, 0.0 }
  0x87   :  { %131 = vmatmul.msk.f32.vlgmr.msra.gmra.mxu1 %vm68_vm1, %v59_v11 }
 0x104   :  { %v89_v17 = vpop.f32.mrf.mxu1 }
 0x105   :  { %v90_v18 = vadd.f32 %v134_v16, %v89_v17 }
 0x107   :  { %v92_v19 = vmax.f32 %v90_v18, 0.0 }
 0x109   :  { %132 = vmatmul.msk.f32.vlgmr.msra.gmra.mxu2 %vm68_vm1, %v92_v19 }
 0x18c   :  { %v121_v21 = vpop.f32.mrf.mxu2 }
 0x18d   :  { %v122_v22 = vadd.f32 %v135_v20, %v121_v21 }
 0x18f   :  { %125 = vst.msk [vmem:[%s230_s7] sm:$0xff] %vm124_vm2, %v122_v22 }

</bundles_post_ra>
